<compile_context>
chip_gen: v5e
topology: v5e:2x2
jax: 0.10.0
libtpu: 0.0.40
codegen_flags: <defaults>
</compile_context>

<pallas_src>
import jax
import jax.numpy as jnp
from jax.experimental import pallas as pl
from jax.experimental.pallas import tpu as pltpu


# ----------------------------- in-kernel math helpers -----------------------------

def _col_terms(x):
    """Horizontal central difference and [1,2,1] smoothing with edge clamping.

    Built from XLU lane rotations + one-lane fixups instead of lane-misaligned
    slice/concat buffers.
    """
    w = x.shape[-1]
    lane = jax.lax.broadcasted_iota(jnp.int32, x.shape, x.ndim - 1)
    left_r = pltpu.roll(x, 1, x.ndim - 1)        # x[:, c-1]  (wraps at c = 0)
    right_r = pltpu.roll(x, w - 1, x.ndim - 1)   # x[:, c+1]  (wraps at c = w-1)
    left = jnp.where(lane == 0, x[..., 0:1], left_r)              # clamp col -1 -> col 0
    right = jnp.where(lane == w - 1, left_r[..., 0:1], right_r)   # clamp col w  -> col w-1
    cdiff = right - left
    hsum = left + 2.0 * x + right
    return cdiff, hsum


def _normals(d, row_above, row_below, fx, fy, cx, cy, row0):
    """d: (TH, W) f32 depth tile; halo rows (1, W) f32. Returns n0, n1, n2 (TH, W) f32."""
    TH, W = d.shape

    cdiff_d, hsum_d = _col_terms(d)
    cdiff_a, hsum_a = _col_terms(row_above)
    cdiff_b, hsum_b = _col_terms(row_below)

    sub = jax.lax.broadcasted_iota(jnp.int32, (TH, W), 0)
    # row r-1 / r+1 terms via XLU sublane rotation; edge rows patched from the halos.
    cdiff_up = jnp.where(sub == 0, cdiff_a, pltpu.roll(cdiff_d, 1, 0))
    hsum_up = jnp.where(sub == 0, hsum_a, pltpu.roll(hsum_d, 1, 0))
    cdiff_dn = jnp.where(sub == TH - 1, cdiff_b, pltpu.roll(cdiff_d, TH - 1, 0))
    hsum_dn = jnp.where(sub == TH - 1, hsum_b, pltpu.roll(hsum_d, TH - 1, 0))

    # Separable Sobel (F.conv2d = cross-correlation, no kernel flip):
    #   kern_x = vertical [1,2,1] (x) horizontal [-1,0,1];  kern_y = its transpose.
    gx = (cdiff_up + 2.0 * cdiff_d + cdiff_dn) * 0.125
    gy = (hsum_dn - hsum_up) * 0.125

    # Un-projection normal; intrinsics folded into small 1-D iotas (broadcast in the mul).
    u = jax.lax.broadcasted_iota(jnp.int32, (1, W), 1).astype(jnp.float32) - cx
    v = jax.lax.broadcasted_iota(jnp.int32, (TH, 1), 0).astype(jnp.float32) + (row0 - cy)

    n0 = -fx * gx
    n1 = -fy * gy
    n2 = u * gx + v * gy + d

    # F.normalize(p=2, dim=1, eps=1e-12): x / max(||x||, 1e-12)
    inv = jax.lax.rsqrt(jnp.maximum(n0 * n0 + n1 * n1 + n2 * n2, 1e-24))
    return n0 * inv, n1 * inv, n2 * inv


def _store(out_ref, n0, n1, n2):
    out_ref[0, 0] = n0.astype(out_ref.dtype)
    out_ref[0, 1] = n1.astype(out_ref.dtype)
    out_ref[0, 2] = n2.astype(out_ref.dtype)


# ----------------------------------- kernels --------------------------------------

def _kernel_single(params_ref, d_ref, out_ref):
    # Whole image height in one row tile: halos derived from the tile itself.
    b = pl.program_id(0)
    TH = d_ref.shape[1]
    fx = params_ref[b, 0]
    fy = params_ref[b, 1]
    cx = params_ref[b, 2]
    cy = params_ref[b, 3]

    d = d_ref[0].astype(jnp.float32)
    row_above = d[0:1, :]                                       # ReplicationPad2d top
    row_below = 2.0 * d[TH - 1:TH, :] - d[TH - 2:TH - 1, :]     # bottom-row extrapolation
    n0, n1, n2 = _normals(d, row_above, row_below, fx, fy, cx, cy, 0.0)
    _store(out_ref, n0, n1, n2)


def _kernel_tiled(params_ref, d_ref, top_ref, bot_ref, out_ref):
    # params_ref: SMEM (B, 4)     -> [fx, fy, cx, cy] per batch
    # d_ref:      VMEM (1, TH, W) -> current row tile of depth (native dtype)
    # top_ref:    VMEM (1, 8, W)  -> 8-row block containing row i*TH - 1
    # bot_ref:    VMEM (1, 8, W)  -> 8-row block containing row (i+1)*TH
    b = pl.program_id(0)
    i = pl.program_id(1)
    n_tiles = pl.num_programs(1)
    TH = d_ref.shape[1]
    fx = params_ref[b, 0]
    fy = params_ref[b, 1]
    cx = params_ref[b, 2]
    cy = params_ref[b, 3]

    d = d_ref[0].astype(jnp.float32)
    # Row above: row i*TH-1 sits at local row 7 of the fetched (clamped) 8-row block;
    # for the first tile replicate row 0 (ReplicationPad2d top).
    row_above = jnp.where(i == 0, d[0:1, :], top_ref[0, 7:8, :].astype(jnp.float32))
    # Row below: first row of the next 8-row block; for the last tile use the in-place
    # bottom-row extrapolation 2*d[-1] - d[-2] (rows -1/-2 are inside the tile).
    row_below = jnp.where(i == n_tiles - 1,
                          2.0 * d[TH - 1:TH, :] - d[TH - 2:TH - 1, :],
                          bot_ref[0, 0:1, :].astype(jnp.float32))
    row0 = (i * TH).astype(jnp.float32)
    n0, n1, n2 = _normals(d, row_above, row_below, fx, fy, cx, cy, row0)
    _store(out_ref, n0, n1, n2)


# ----------------------------------- wrapper ---------------------------------------

def _vmem_capacity_bytes():
    try:
        return int(pltpu.get_tpu_info().vmem_capacity_bytes)
    except Exception:
        return 128 * 1024 * 1024


def _vmem_limit_bytes():
    cap = _vmem_capacity_bytes()
    return int(min(cap * 3 // 4, 96 * 1024 * 1024))


def _pick_row_tile(H8, W, B, target=256):
    """Chip/width-aware row tile (multiple of 8). H8 = H rounded up to a multiple of 8."""
    vmem = _vmem_capacity_bytes()
    # ~18 live f32 (TH, W) planes: double-buffered input + 3-channel output tiles plus
    # in-kernel temporaries; keep the working set under ~half of VMEM.
    cap = (vmem // 2) // (18 * 4 * max(W, 128))
    cap = max(8, min(cap, target))
    # Megacore (v7x): aim for B * n_tiles >= 4 parallel grid steps, but never shrink the
    # tile below 64 rows just for that (halo re-reads + ~0.35us/step overhead dominate).
    if B < 4:
        need = -(-4 // B)                       # ceil(4 / B) tiles per image
        cap = min(cap, max(64, H8 // need))
    cap -= cap % 8
    cap = max(8, cap)
    if H8 <= cap:
        return H8
    for cand in range(cap, 63, -8):             # prefer an exact divisor (no row padding)
        if H8 % cand == 0:
            return cand
    return cap                                  # no nice divisor: pad rows to a multiple


def normal_from_depth_dense(depth, K, *, row_tile=None, out_dtype=None):
    """depth: (B, 1, H, W); K: (B, 3, 3)  ->  (B, 3, H, W) surface normals.

    Matches PyTorch NormalFromDepthDense: ReplicationPad2d + Sobel/8 with the padded
    bottom row replaced by 2*d[-1]-d[-2], un-projection with K, L2 normalize over dim 1.
    """
    B, C, H, W = depth.shape
    assert C == 1, "depth must be (B, 1, H, W)"
    assert H >= 2 and W >= 2, "need at least a 2x2 depth map"
    if out_dtype is None:
        out_dtype = depth.dtype                 # bf16 in -> bf16 out halves write traffic

    d = depth[:, 0, :, :]                       # (B, H, W), native dtype; cast in-kernel
    # Per-batch intrinsics packed as SMEM scalars [fx, fy, cx, cy].
    params = jnp.stack([K[:, 0, 0], K[:, 1, 1], K[:, 0, 2], K[:, 1, 2]],
                       axis=1).astype(jnp.float32)

    # Lane-dense columns: pad W (right side only, so cx is unchanged) to a multiple of
    # 128 with edge replication; padded columns reproduce the clamp and are sliced off.
    Wp = ((W + 127) // 128) * 128
    if Wp != W:
        d = jnp.pad(d, ((0, 0), (0, 0), (0, Wp - W)), mode="edge")

    H8 = ((H + 7) // 8) * 8
    if row_tile is None:
        TH = _pick_row_tile(H8, Wp, B)
    else:
        TH = int(row_tile)
        assert TH % 8 == 0 and TH >= 8, "row_tile must be a positive multiple of 8"
        TH = max(TH, min(64, H8))               # tiny tiles: halo re-reads + step overhead
        TH = min(TH, H8)

    # Pad rows (bottom only) so the grid tiles evenly.  The first padded row carries the
    # Sobel bottom-row extrapolation so the last real row sees exactly the un-padded
    # neighbourhood; padded rows are sliced off afterwards.
    Hp = ((H + TH - 1) // TH) * TH
    if Hp != H:
        extra = (2.0 * d[:, H - 1, :].astype(jnp.float32)
                 - d[:, H - 2, :].astype(jnp.float32)).astype(d.dtype)
        d = jnp.concatenate(
            [d, jnp.broadcast_to(extra[:, None, :], (B, Hp - H, Wp))], axis=1)

    n_tiles = Hp // TH
    thb = TH // 8                 # row-tile size measured in 8-row halo blocks
    nblk8 = Hp // 8               # number of 8-row blocks covering Hp

    in_specs = [
        pl.BlockSpec(memory_space=pltpu.MemorySpace.SMEM),      # intrinsics (SMEM scalars)
        pl.BlockSpec((1, TH, Wp), lambda b, i: (b, i, 0)),      # depth row tile
    ]
    args = [params, d]
    if n_tiles == 1:
        kernel = _kernel_single
    else:
        kernel = _kernel_tiled
        in_specs += [
            # 8-row block containing row i*TH - 1 (clamped; unused for i == 0)
            pl.BlockSpec((1, 8, Wp),
                         lambda b, i: (b, jnp.maximum(i * thb - 1, 0), 0)),
            # 8-row block containing row (i+1)*TH (clamped; unused for the last tile)
            pl.BlockSpec((1, 8, Wp),
                         lambda b, i: (b, jnp.minimum((i + 1) * thb, nblk8 - 1), 0)),
        ]
        args += [d, d]

    in_bytes = jnp.dtype(d.dtype).itemsize
    out_bytes = jnp.dtype(out_dtype).itemsize
    cost = pl.CostEstimate(
        flops=int(30 * B * Hp * Wp),
        transcendentals=int(B * Hp * Wp),
        bytes_accessed=int(B * Hp * Wp * (in_bytes + 3 * out_bytes)),
    )

    out = pl.pallas_call(
        kernel,
        out_shape=jax.ShapeDtypeStruct((B, 3, Hp, Wp), out_dtype),
        grid=(B, n_tiles),
        in_specs=in_specs,
        out_specs=pl.BlockSpec((1, 3, TH, Wp), lambda b, i: (b, 0, i, 0)),
        compiler_params=pltpu.CompilerParams(
            dimension_semantics=("parallel", "parallel"),
            vmem_limit_bytes=_vmem_limit_bytes(),
        ),
        cost_estimate=cost,
    )(*args)

    if Hp != H or Wp != W:
        out = out[:, :, :H, :W]
    return out


# ----------------------------- pure-JAX reference -----------------------------------

def _reference(depth, K):
    """Pure-JAX reference reproducing the PyTorch semantics (f32 math)."""
    B, _, H, W = depth.shape
    d2 = depth[:, 0].astype(jnp.float32)
    pad = jnp.pad(d2, ((0, 0), (1, 1), (1, 1)), mode="edge")
    pad = pad.at[:, -1, :].set(2.0 * pad[:, -2, :] - pad[:, -3, :])
    gx = ((pad[:, 0:H, 2:W + 2] - pad[:, 0:H, 0:W])
          + 2.0 * (pad[:, 1:H + 1, 2:W + 2] - pad[:, 1:H + 1, 0:W])
          + (pad[:, 2:H + 2, 2:W + 2] - pad[:, 2:H + 2, 0:W])) / 8.0
    gy = ((pad[:, 2:H + 2, 0:W] - pad[:, 0:H, 0:W])
          + 2.0 * (pad[:, 2:H + 2, 1:W + 1] - pad[:, 0:H, 1:W + 1])
          + (pad[:, 2:H + 2, 2:W + 2] - pad[:, 0:H, 2:W + 2])) / 8.0
    fx = K[:, 0, 0][:, None, None].astype(jnp.float32)
    fy = K[:, 1, 1][:, None, None].astype(jnp.float32)
    cx = K[:, 0, 2][:, None, None].astype(jnp.float32)
    cy = K[:, 1, 2][:, None, None].astype(jnp.float32)
    gyi = jnp.arange(H, dtype=jnp.float32)[:, None] * jnp.ones((1, W), jnp.float32)
    gxi = jnp.ones((H, 1), jnp.float32) * jnp.arange(W, dtype=jnp.float32)[None, :]
    n0 = -fx * gx
    n1 = -fy * gy
    n2 = (gxi - cx) * gx + (gyi - cy) * gy + d2
    n = jnp.stack([n0, n1, n2], axis=1)
    denom = jnp.maximum(jnp.sqrt(jnp.sum(n * n, axis=1, keepdims=True)), 1e-12)
    return n / denom


# -------------------------------------- test ----------------------------------------

if __name__ == "__main__":
    key = jax.random.PRNGKey(0)

    def make_inputs(k, B, H, W, dtype=jnp.float32):
        k1, k2 = jax.random.split(k)
        depth = 1.0 + jax.random.uniform(k1, (B, 1, H, W), dtype=jnp.float32) * 4.0
        fx = 20.0 + jax.random.uniform(k2, (B,), dtype=jnp.float32)
        K = jnp.zeros((B, 3, 3), jnp.float32)
        K = K.at[:, 0, 0].set(fx)
        K = K.at[:, 1, 1].set(fx * 1.05)
        K = K.at[:, 0, 2].set(W / 2.0)
        K = K.at[:, 1, 2].set(H / 2.0)
        K = K.at[:, 2, 2].set(1.0)
        return depth.astype(dtype), K

    ks = jax.random.split(key, 4)

    # 1) single-tile path (no halo inputs), lane-aligned shape.
    depth, K = make_inputs(ks[0], B=4, H=16, W=128)
    out = jax.block_until_ready(normal_from_depth_dense(depth, K))
    assert out.shape == (4, 3, 16, 128) and out.dtype == jnp.float32
    assert jnp.allclose(out, _reference(depth, K), atol=2e-4, rtol=1e-4), \
        "mismatch vs reference (single-tile)"

    # 2) multi-tile path with halo row blocks (default picker -> 64-row tiles, grid 2x2).
    depth, K = make_inputs(ks[1], B=2, H=128, W=128)
    out = jax.block_until_ready(normal_from_depth_dense(depth, K))
    assert out.shape == (2, 3, 128, 128)
    assert jnp.allclose(out, _reference(depth, K), atol=2e-4, rtol=1e-4), \
        "mismatch vs reference (multi-tile)"

    # 3) bf16 input + bf16 output (native-dtype read path, halved HBM write traffic).
    depth_bf, K = make_inputs(ks[2], B=2, H=128, W=128, dtype=jnp.bfloat16)
    out_bf = jax.block_until_ready(normal_from_depth_dense(depth_bf, K))
    assert out_bf.dtype == jnp.bfloat16
    assert jnp.allclose(out_bf.astype(jnp.float32), _reference(depth_bf, K),
                        atol=3e-2, rtol=3e-2), "mismatch vs reference (bf16)"

    # 4) unaligned H/W (pad-and-slice path) + user row_tile (clamped to a sane minimum).
    depth, K = make_inputs(ks[3], B=2, H=12, W=96)
    out = jax.block_until_ready(normal_from_depth_dense(depth, K, row_tile=8))
    assert out.shape == (2, 3, 12, 96)
    assert jnp.allclose(out, _reference(depth, K), atol=2e-4, rtol=1e-4), \
        "mismatch vs reference (padded shape)"

    print("KERNEL_OK")
</pallas_src>

<mosaic_0001>
module attributes {stable_mosaic.version = 11 : i64} {
  func.func @_kernel_single(%arg0: i32, %arg1: i32, %arg2: memref<4x4xf32, #tpu.memory_space<smem>>, %arg3: memref<1x16x128xf32, #tpu.memory_space<vmem>>, %arg4: memref<1x3x16x128xf32, #tpu.memory_space<vmem>>) attributes {dimension_semantics = [#tpu.dimension_semantics<parallel>, #tpu.dimension_semantics<parallel>], iteration_bounds = array<i64: 4, 1>, scalar_prefetch = 0 : i64, scratch_operands = 0 : i64, tpu.core_type = #tpu.core_type<tc>, window_params = [{transform_indices = @transform_0, window_bounds = array<i64: 4, 4>}, {transform_indices = @transform_1, window_bounds = array<i64: 1, 16, 128>}, {transform_indices = @transform_2, window_bounds = array<i64: 1, 3, 16, 128>}]} {
    %0 = arith.index_cast %arg0 : i32 to index
    %c0 = arith.constant 0 : index
    %1 = memref.load %arg2[%0, %c0] : memref<4x4xf32, #tpu.memory_space<smem>>
    %2 = arith.index_cast %arg0 : i32 to index
    %c1 = arith.constant 1 : index
    %3 = memref.load %arg2[%2, %c1] : memref<4x4xf32, #tpu.memory_space<smem>>
    %4 = arith.index_cast %arg0 : i32 to index
    %c2 = arith.constant 2 : index
    %5 = memref.load %arg2[%4, %c2] : memref<4x4xf32, #tpu.memory_space<smem>>
    %6 = arith.index_cast %arg0 : i32 to index
    %c3 = arith.constant 3 : index
    %7 = memref.load %arg2[%6, %c3] : memref<4x4xf32, #tpu.memory_space<smem>>
    %c0_0 = arith.constant 0 : index
    %c0_1 = arith.constant 0 : index
    %c0_2 = arith.constant 0 : index
    %8 = vector.load %arg3[%c0_0, %c0_1, %c0_2] : memref<1x16x128xf32, #tpu.memory_space<vmem>>, vector<1x16x128xf32>
    %9 = vector.shape_cast %8 : vector<1x16x128xf32> to vector<16x128xf32>
    %10 = vector.extract_strided_slice %9 {offsets = [0, 0], sizes = [1, 128], strides = [1, 1]} : vector<16x128xf32> to vector<1x128xf32>
    %11 = vector.extract_strided_slice %9 {offsets = [15, 0], sizes = [1, 128], strides = [1, 1]} : vector<16x128xf32> to vector<1x128xf32>
    %cst = arith.constant 2.000000e+00 : f32
    %12 = vector.broadcast %cst : f32 to vector<1x128xf32>
    %13 = arith.mulf %12, %11 : vector<1x128xf32>
    %14 = vector.extract_strided_slice %9 {offsets = [14, 0], sizes = [1, 128], strides = [1, 1]} : vector<16x128xf32> to vector<1x128xf32>
    %15 = arith.subf %13, %14 : vector<1x128xf32>
    %16 = tpu.iota {dimensions = array<i32: 1>} : vector<16x128xi32>
    %c1_i32 = arith.constant 1 : i32
    %17 = tpu.dynamic_rotate %9 by %c1_i32 dim 1 : vector<16x128xf32>, i32 -> vector<16x128xf32>
    %c127_i32 = arith.constant 127 : i32
    %18 = tpu.dynamic_rotate %9 by %c127_i32 dim 1 : vector<16x128xf32>, i32 -> vector<16x128xf32>
    %c0_i32 = arith.constant 0 : i32
    %19 = vector.broadcast %c0_i32 : i32 to vector<16x128xi32>
    %20 = arith.cmpi eq, %16, %19 : vector<16x128xi32>
    %21 = vector.extract_strided_slice %9 {offsets = [0, 0], sizes = [16, 1], strides = [1, 1]} : vector<16x128xf32> to vector<16x1xf32>
    %22 = vector.shape_cast %21 : vector<16x1xf32> to vector<16x1xf32>
    %23 = vector.broadcast %22 : vector<16x1xf32> to vector<16x128xf32>
    %24 = arith.select %20, %23, %17 : vector<16x128xi1>, vector<16x128xf32>
    %c127_i32_3 = arith.constant 127 : i32
    %25 = vector.broadcast %c127_i32_3 : i32 to vector<16x128xi32>
    %26 = arith.cmpi eq, %16, %25 : vector<16x128xi32>
    %27 = vector.extract_strided_slice %17 {offsets = [0, 0], sizes = [16, 1], strides = [1, 1]} : vector<16x128xf32> to vector<16x1xf32>
    %28 = vector.shape_cast %27 : vector<16x1xf32> to vector<16x1xf32>
    %29 = vector.broadcast %28 : vector<16x1xf32> to vector<16x128xf32>
    %30 = arith.select %26, %29, %18 : vector<16x128xi1>, vector<16x128xf32>
    %31 = arith.subf %30, %24 : vector<16x128xf32>
    %cst_4 = arith.constant 2.000000e+00 : f32
    %32 = vector.broadcast %cst_4 : f32 to vector<16x128xf32>
    %33 = arith.mulf %32, %9 : vector<16x128xf32>
    %34 = arith.addf %24, %33 : vector<16x128xf32>
    %35 = arith.addf %34, %30 : vector<16x128xf32>
    %36 = tpu.iota {dimensions = array<i32: 1>} : vector<1x128xi32>
    %c1_i32_5 = arith.constant 1 : i32
    %37 = tpu.dynamic_rotate %10 by %c1_i32_5 dim 1 : vector<1x128xf32>, i32 -> vector<1x128xf32>
    %c127_i32_6 = arith.constant 127 : i32
    %38 = tpu.dynamic_rotate %10 by %c127_i32_6 dim 1 : vector<1x128xf32>, i32 -> vector<1x128xf32>
    %c0_i32_7 = arith.constant 0 : i32
    %39 = vector.broadcast %c0_i32_7 : i32 to vector<1x128xi32>
    %40 = arith.cmpi eq, %36, %39 : vector<1x128xi32>
    %41 = vector.extract_strided_slice %10 {offsets = [0, 0], sizes = [1, 1], strides = [1, 1]} : vector<1x128xf32> to vector<1x1xf32>
    %42 = vector.shape_cast %41 : vector<1x1xf32> to vector<1x1xf32>
    %43 = vector.broadcast %42 : vector<1x1xf32> to vector<1x128xf32>
    %44 = arith.select %40, %43, %37 : vector<1x128xi1>, vector<1x128xf32>
    %c127_i32_8 = arith.constant 127 : i32
    %45 = vector.broadcast %c127_i32_8 : i32 to vector<1x128xi32>
    %46 = arith.cmpi eq, %36, %45 : vector<1x128xi32>
    %47 = vector.extract_strided_slice %37 {offsets = [0, 0], sizes = [1, 1], strides = [1, 1]} : vector<1x128xf32> to vector<1x1xf32>
    %48 = vector.shape_cast %47 : vector<1x1xf32> to vector<1x1xf32>
    %49 = vector.broadcast %48 : vector<1x1xf32> to vector<1x128xf32>
    %50 = arith.select %46, %49, %38 : vector<1x128xi1>, vector<1x128xf32>
    %51 = arith.subf %50, %44 : vector<1x128xf32>
    %cst_9 = arith.constant 2.000000e+00 : f32
    %52 = vector.broadcast %cst_9 : f32 to vector<1x128xf32>
    %53 = arith.mulf %52, %10 : vector<1x128xf32>
    %54 = arith.addf %44, %53 : vector<1x128xf32>
    %55 = arith.addf %54, %50 : vector<1x128xf32>
    %56 = tpu.iota {dimensions = array<i32: 1>} : vector<1x128xi32>
    %c1_i32_10 = arith.constant 1 : i32
    %57 = tpu.dynamic_rotate %15 by %c1_i32_10 dim 1 : vector<1x128xf32>, i32 -> vector<1x128xf32>
    %c127_i32_11 = arith.constant 127 : i32
    %58 = tpu.dynamic_rotate %15 by %c127_i32_11 dim 1 : vector<1x128xf32>, i32 -> vector<1x128xf32>
    %c0_i32_12 = arith.constant 0 : i32
    %59 = vector.broadcast %c0_i32_12 : i32 to vector<1x128xi32>
    %60 = arith.cmpi eq, %56, %59 : vector<1x128xi32>
    %61 = vector.extract_strided_slice %15 {offsets = [0, 0], sizes = [1, 1], strides = [1, 1]} : vector<1x128xf32> to vector<1x1xf32>
    %62 = vector.shape_cast %61 : vector<1x1xf32> to vector<1x1xf32>
    %63 = vector.broadcast %62 : vector<1x1xf32> to vector<1x128xf32>
    %64 = arith.select %60, %63, %57 : vector<1x128xi1>, vector<1x128xf32>
    %c127_i32_13 = arith.constant 127 : i32
    %65 = vector.broadcast %c127_i32_13 : i32 to vector<1x128xi32>
    %66 = arith.cmpi eq, %56, %65 : vector<1x128xi32>
    %67 = vector.extract_strided_slice %57 {offsets = [0, 0], sizes = [1, 1], strides = [1, 1]} : vector<1x128xf32> to vector<1x1xf32>
    %68 = vector.shape_cast %67 : vector<1x1xf32> to vector<1x1xf32>
    %69 = vector.broadcast %68 : vector<1x1xf32> to vector<1x128xf32>
    %70 = arith.select %66, %69, %58 : vector<1x128xi1>, vector<1x128xf32>
    %71 = arith.subf %70, %64 : vector<1x128xf32>
    %cst_14 = arith.constant 2.000000e+00 : f32
    %72 = vector.broadcast %cst_14 : f32 to vector<1x128xf32>
    %73 = arith.mulf %72, %15 : vector<1x128xf32>
    %74 = arith.addf %64, %73 : vector<1x128xf32>
    %75 = arith.addf %74, %70 : vector<1x128xf32>
    %76 = tpu.iota {dimensions = array<i32: 0>} : vector<16x128xi32>
    %c0_i32_15 = arith.constant 0 : i32
    %77 = vector.broadcast %c0_i32_15 : i32 to vector<16x128xi32>
    %78 = arith.cmpi eq, %76, %77 : vector<16x128xi32>
    %c1_i32_16 = arith.constant 1 : i32
    %79 = tpu.dynamic_rotate %31 by %c1_i32_16 dim 0 : vector<16x128xf32>, i32 -> vector<16x128xf32>
    %80 = vector.shape_cast %51 : vector<1x128xf32> to vector<1x128xf32>
    %81 = vector.broadcast %80 : vector<1x128xf32> to vector<16x128xf32>
    %82 = arith.select %78, %81, %79 : vector<16x128xi1>, vector<16x128xf32>
    %c0_i32_17 = arith.constant 0 : i32
    %83 = vector.broadcast %c0_i32_17 : i32 to vector<16x128xi32>
    %84 = arith.cmpi eq, %76, %83 : vector<16x128xi32>
    %c1_i32_18 = arith.constant 1 : i32
    %85 = tpu.dynamic_rotate %35 by %c1_i32_18 dim 0 : vector<16x128xf32>, i32 -> vector<16x128xf32>
    %86 = vector.shape_cast %55 : vector<1x128xf32> to vector<1x128xf32>
    %87 = vector.broadcast %86 : vector<1x128xf32> to vector<16x128xf32>
    %88 = arith.select %84, %87, %85 : vector<16x128xi1>, vector<16x128xf32>
    %c15_i32 = arith.constant 15 : i32
    %89 = vector.broadcast %c15_i32 : i32 to vector<16x128xi32>
    %90 = arith.cmpi eq, %76, %89 : vector<16x128xi32>
    %c15_i32_19 = arith.constant 15 : i32
    %91 = tpu.dynamic_rotate %31 by %c15_i32_19 dim 0 : vector<16x128xf32>, i32 -> vector<16x128xf32>
    %92 = vector.shape_cast %71 : vector<1x128xf32> to vector<1x128xf32>
    %93 = vector.broadcast %92 : vector<1x128xf32> to vector<16x128xf32>
    %94 = arith.select %90, %93, %91 : vector<16x128xi1>, vector<16x128xf32>
    %c15_i32_20 = arith.constant 15 : i32
    %95 = vector.broadcast %c15_i32_20 : i32 to vector<16x128xi32>
    %96 = arith.cmpi eq, %76, %95 : vector<16x128xi32>
    %c15_i32_21 = arith.constant 15 : i32
    %97 = tpu.dynamic_rotate %35 by %c15_i32_21 dim 0 : vector<16x128xf32>, i32 -> vector<16x128xf32>
    %98 = vector.shape_cast %75 : vector<1x128xf32> to vector<1x128xf32>
    %99 = vector.broadcast %98 : vector<1x128xf32> to vector<16x128xf32>
    %100 = arith.select %96, %99, %97 : vector<16x128xi1>, vector<16x128xf32>
    %cst_22 = arith.constant 2.000000e+00 : f32
    %101 = vector.broadcast %cst_22 : f32 to vector<16x128xf32>
    %102 = arith.mulf %101, %31 : vector<16x128xf32>
    %103 = arith.addf %82, %102 : vector<16x128xf32>
    %104 = arith.addf %103, %94 : vector<16x128xf32>
    %cst_23 = arith.constant 1.250000e-01 : f32
    %105 = vector.broadcast %cst_23 : f32 to vector<16x128xf32>
    %106 = arith.mulf %104, %105 : vector<16x128xf32>
    %107 = arith.subf %100, %88 : vector<16x128xf32>
    %cst_24 = arith.constant 1.250000e-01 : f32
    %108 = vector.broadcast %cst_24 : f32 to vector<16x128xf32>
    %109 = arith.mulf %107, %108 : vector<16x128xf32>
    %110 = tpu.iota {dimensions = array<i32: 1>} : vector<1x128xi32>
    %111 = arith.sitofp %110 : vector<1x128xi32> to vector<1x128xf32>
    %112 = vector.broadcast %5 : f32 to vector<1x128xf32>
    %113 = arith.subf %111, %112 : vector<1x128xf32>
    %114 = tpu.iota {dimensions = array<i32: 0>} : vector<16x1xi32>
    %115 = arith.sitofp %114 : vector<16x1xi32> to vector<16x1xf32>
    %cst_25 = arith.constant 0.000000e+00 : f32
    %116 = arith.subf %cst_25, %7 : f32
    %117 = vector.broadcast %116 : f32 to vector<16x1xf32>
    %118 = arith.addf %115, %117 : vector<16x1xf32>
    %cst_26 = arith.constant 0.000000e+00 : f32
    %119 = arith.subf %cst_26, %1 : f32
    %120 = vector.broadcast %119 : f32 to vector<16x128xf32>
    %121 = arith.mulf %120, %106 : vector<16x128xf32>
    %cst_27 = arith.constant 0.000000e+00 : f32
    %122 = arith.subf %cst_27, %3 : f32
    %123 = vector.broadcast %122 : f32 to vector<16x128xf32>
    %124 = arith.mulf %123, %109 : vector<16x128xf32>
    %125 = vector.broadcast %113 : vector<1x128xf32> to vector<16x128xf32>
    %126 = arith.mulf %125, %106 : vector<16x128xf32>
    %127 = vector.broadcast %118 : vector<16x1xf32> to vector<16x128xf32>
    %128 = arith.mulf %127, %109 : vector<16x128xf32>
    %129 = arith.addf %126, %128 : vector<16x128xf32>
    %130 = arith.addf %129, %9 : vector<16x128xf32>
    %131 = arith.mulf %121, %121 : vector<16x128xf32>
    %132 = arith.mulf %124, %124 : vector<16x128xf32>
    %133 = arith.addf %131, %132 : vector<16x128xf32>
    %134 = arith.mulf %130, %130 : vector<16x128xf32>
    %135 = arith.addf %133, %134 : vector<16x128xf32>
    %cst_28 = arith.constant 1.000000e-24 : f32
    %136 = vector.broadcast %cst_28 : f32 to vector<16x128xf32>
    %137 = arith.maximumf %135, %136 : vector<16x128xf32>
    %138 = math.rsqrt %137 : vector<16x128xf32>
    %139 = arith.mulf %121, %138 : vector<16x128xf32>
    %140 = arith.mulf %124, %138 : vector<16x128xf32>
    %141 = arith.mulf %130, %138 : vector<16x128xf32>
    %c0_29 = arith.constant 0 : index
    %c0_30 = arith.constant 0 : index
    %c0_31 = arith.constant 0 : index
    %c0_32 = arith.constant 0 : index
    %142 = vector.load %arg4[%c0_29, %c0_30, %c0_31, %c0_32] : memref<1x3x16x128xf32, #tpu.memory_space<vmem>>, vector<1x1x16x128xf32>
    %143 = vector.shape_cast %142 : vector<1x1x16x128xf32> to vector<16x128xf32>
    %144 = vector.shape_cast %139 : vector<16x128xf32> to vector<1x1x16x128xf32>
    tpu.vector_store %arg4[%c0_29, %c0_30, %c0_31, %c0_32], %144 {strides = array<i32>} : memref<1x3x16x128xf32, #tpu.memory_space<vmem>>, vector<1x1x16x128xf32>,
    %c0_33 = arith.constant 0 : index
    %c1_34 = arith.constant 1 : index
    %c0_35 = arith.constant 0 : index
    %c0_36 = arith.constant 0 : index
    %145 = vector.load %arg4[%c0_33, %c1_34, %c0_35, %c0_36] : memref<1x3x16x128xf32, #tpu.memory_space<vmem>>, vector<1x1x16x128xf32>
    %146 = vector.shape_cast %145 : vector<1x1x16x128xf32> to vector<16x128xf32>
    %147 = vector.shape_cast %140 : vector<16x128xf32> to vector<1x1x16x128xf32>
    tpu.vector_store %arg4[%c0_33, %c1_34, %c0_35, %c0_36], %147 {strides = array<i32>} : memref<1x3x16x128xf32, #tpu.memory_space<vmem>>, vector<1x1x16x128xf32>,
    %c0_37 = arith.constant 0 : index
    %c2_38 = arith.constant 2 : index
    %c0_39 = arith.constant 0 : index
    %c0_40 = arith.constant 0 : index
    %148 = vector.load %arg4[%c0_37, %c2_38, %c0_39, %c0_40] : memref<1x3x16x128xf32, #tpu.memory_space<vmem>>, vector<1x1x16x128xf32>
    %149 = vector.shape_cast %148 : vector<1x1x16x128xf32> to vector<16x128xf32>
    %150 = vector.shape_cast %141 : vector<16x128xf32> to vector<1x1x16x128xf32>
    tpu.vector_store %arg4[%c0_37, %c2_38, %c0_39, %c0_40], %150 {strides = array<i32>} : memref<1x3x16x128xf32, #tpu.memory_space<vmem>>, vector<1x1x16x128xf32>,
    return
  }
  func.func @transform_0(%arg0: i32, %arg1: i32) -> (i32, i32) {
    %c0_i32 = arith.constant 0 : i32
    %c0_i32_0 = arith.constant 0 : i32
    %c0_i32_1 = arith.constant 0 : i32
    return %c0_i32, %c0_i32_0 : i32, i32
  }
  func.func @transform_1(%arg0: i32, %arg1: i32) -> (i32, i32, i32) {
    %c0_i32 = arith.constant 0 : i32
    %c0_i32_0 = arith.constant 0 : i32
    return %arg0, %arg1, %c0_i32 : i32, i32, i32
  }
  func.func @transform_2(%arg0: i32, %arg1: i32) -> (i32, i32, i32, i32) {
    %c0_i32 = arith.constant 0 : i32
    %c0_i32_0 = arith.constant 0 : i32
    %c0_i32_1 = arith.constant 0 : i32
    return %arg0, %c0_i32, %arg1, %c0_i32_0 : i32, i32, i32, i32
  }
}

</mosaic_0001>

<bundles_post_ra>
// kernel: tpu_custom_call.1
= control target key start
LH: loop header
LB: loop body
LE: loop exit
PB: predicated region body
PF: predicated region fallthrough
CT: control target
= control target key end

     0   :  { %7 = vsyncpa [#allocation5], 0  ;;  %s997_s0 = inlined_call_operand.hbm [shape: f32[4,4], index: 0, kind: input, shape index: {}]   ;;  %s998_s1 = inlined_call_operand.hbm [shape: f32[4,16,128], index: 1, kind: input, shape index: {}]   ;;  %s999_s2 = inlined_call_operand.hbm [shape: f32[4,3,16,128], index: 2, kind: output, shape index: {}]  }
   0x1   :  { %8 = vsyncpa [#allocation3], 0 }
   0x2   :  { %10 = vsyncpa [#allocation3 + $0x1], 0 }
   0x3   :  { %11 = vsyncpa [#allocation4], 0 }
   0x4   :  { %13 = vsyncpa [#allocation4 + $0x1], 0  ;;  %s787_s9 = smov 0   ;;  %s789_s10 = smov 0  }
   0x5   :  { %s791_s11 = smov 0   ;;  %s793_s12 = smov 0  }
   0x6   :  { %s795_s13 = smov 0   ;;  %s797_s14 = smov 0  }
   0x7 LB: > { %s522_s15 = sadd.s32 4294967295, %s762_s14   ;;  %s523_s16 = sadd.s32 4294967294, %s762_s14   ;;  %s762_s14 = sphi %s797_s14, %s19_s14   ;;  %s758_s13 = sphi %s795_s13, %s1010_s13   ;;  %s754_s12 = sphi %s793_s12, %s1009_s12   ;;  %s750_s11 = sphi %s791_s11, %s1008_s11   ;;  %s746_s10 = sphi %s789_s10, %s1007_s10   ;;  %s742_s9 = sphi %s787_s9, %s1006_s9  }
   0x8   : > { %s61_s17 = sadd.s32 1, %s750_s11  ;;  %p68_p0 = scmp.ne.s32.totalorder %s750_s11, %s746_s10 }
   0x9   : > { %p69_p1 = scmp.eq.s32.totalorder %s762_s14, 0  ;;  %p74_p2 = scmp.ne.s32.totalorder %s746_s10, %s742_s9 }
   0xa   : > { %p825_p3 = scmp.eq.s32.totalorder %s522_s15, 0  ;;  %p100_p4 = scmp.eq.s32.totalorder %s522_s15, 3 }
   0xb   : > { %p70_p5 = por %p69_p1, %p68_p0  ;;  %p106_p6 = scmp.eq.s32.totalorder %s523_s16, 3 }
   0xc   : > { %p831_p7 = por %p825_p3, %p74_p2  ;;  %p835_p8 = por %p100_p4, %p68_p0 }
   0xd   : > { %p839_p9 = por %p106_p6, %p74_p2  ;;  %p524_p10 = scmp.ge.s32.totalorder %s762_s14, 1 }
   0xe   : > { %p113_p11 = scmp.lt.s32.totalorder %s762_s14, 5  ;;  %s125_s24 = sshll.u32 %s997_s0, 4  ;;  %s126_s24 = int_to_ptr.hbm [resolvable:$true] %s125_s24 }
   0xf   : > { %p565_p13 = scmp.lt.s32.totalorder %s762_s14, 4  ;;  %s31_s27 = sadd.s32 1, %s758_s13 }
  0x10   : > { %p848_p12 = pnand %p524_p10, %p113_p11  ;;  %p33_p4 = scmp.ge.s32.totalorder %s31_s27, 4 }
  0x11   : > { %p855_p1 = pnand %p565_p13, %p70_p5  ;;  %s136_s28 = sand.u32 1, %s750_s11  }
  0x12   : > { %p552_p0 = pneg %p848_p12  ;;  %s764_s29 = smov [#allocation2]  }
  0x13   : > { %s1012_s27 = smov (%p33_p4, %s31_s27), 0  ;;  %s527_s30 = sshll.u32 %s136_s28, 4 }
  0x14   : > { %p553_p2 = pnand %p552_p0, %p825_p3  ;;  %s56_s3 = ssub.s32 %s758_s13, %s1012_s27 }
  0x15   : > { %p59_p6 = scmp.eq.s32.totalorder %s56_s3, 0  ;;  %s541_s4 = sshll.u32 %s758_s13, 4 }
  0x16   : > { %555 = dma.hbm_to_smem (!%p553_p2), %s126_s24, 64, %s764_s29, [#allocation5]  }
  0x17   : > { %s147_s7 = scalar_lea.hbm %s998_s1, %s541_s4  ;;  %s140_s8 = scalar_lea.vmem [#allocation6], %s527_s30 }
  0x18   : > { %s150_s15 = sshll.u32 %s140_s8, 4  ;;  %s148_s22 = sshll.u32 %s147_s7, 4  ;;  %s151_s15 = int_to_ptr.vmem [resolvable:$true] %s150_s15  ;;  %s149_s22 = int_to_ptr.hbm [resolvable:$true] %s148_s22 }
  0x19   : > { %s874_s16 = scalar_select %p59_p6, %s750_s11, %s61_s17  }
  0x1a   : > { %s137_s23 = scalar_lea.sflag [#allocation3], %s136_s28  ;;  %s765_s24 = smov 128  }
  0x1b   : > { %s766_s29 = smov 8   ;;  %162 = sbr.rel (%p848_p12) target bundleno = 328 (0x148), region = 28 }
  0x1c   : > { %559 = dma.hbm_to_vmem [thread:$0]  (!%p855_p1), %s149_s22, 256, %s151_s15, %s137_s23, %s765_s24, %s765_s24, %s766_s29  }
  0x20   : > { %729 = dma.done.wait (%p825_p3), [#allocation5], 64  }
  0x21   : > { %731 = vsyncadd (%p825_p3), [#allocation5], 4294967232  ;;  %s885_s17 = sand.u32 1, %s746_s10  }
  0x22   : > { %s532_s28 = sshll.u32 %s885_s17, 4  ;;  %s170_s30 = scalar_lea.sflag [#allocation3], %s885_s17 }
  0x23   : > { %s173_s3 = scalar_lea.vmem [#allocation6], %s532_s28 }
  0x24   : > { %733 = dma.done.wait (%p831_p7), %s170_s30, 256  }
  0x25   : > { %735 = vsyncadd (%p831_p7), %s170_s30, 4294967040 }
  0x26   : > { %179 = sfence }
  0x27   : > { %v893_v0 = vld [vmem:[%s173_s3] sm:$0xff]  ;;  %v895_v1 = vld [vmem:[%s173_s3 + $0x8] sm:$0xff]  ;;  %s767_s18 = smov 1   ;;  %s768_s25 = smov 127   ;;  %v769_v4 = vmov 0   ;;  %v213_v12 = vlaneseq }
  0x28   : > { %215 = vrot.lane.b32.xlu0 %v893_v0, %s767_s18  ;;  %v208_v2 = vmul.f32 2.0, %v895_v1  ;;  %v210_v3 = vrot.slane %v895_v1, 7  ;;  %221 = vrot.lane.b32.xlu2 %v895_v1, %s768_s25  ;;  %s906_s19 = sshll.u32 %s754_s12, 7  ;;  %v250_v19 = vmul.f32 2.0, %v893_v0  ;;  %s542_s29 = smul.u32 48, %s885_s17 }
  0x29   : > { %625 = vset.pattern.permute.xlu0 %v769_v4  ;;  %624 = vset.pattern.permute.xlu2 %v769_v4  ;;  %s204_s26 = sadd.s32 3, %s906_s19  ;;  %s200_s5 = sadd.s32 1, %s906_s19  ;;  %v910_v13 = vand.u32 127, %v213_v12  ;;  %v286_v17 = vshrl.u32 %v213_v12, 7 }
  0x2a   : > { %v212_v5 = vsub.f32 %v208_v2, %v210_v3  ;;  %626 = vset.pattern.permute.xlu1 %v769_v4  ;;  %s205_s4 = sld [smem:[#allocation2 + %s204_s26]]  ;;  %s202_s7 = sadd.s32 2, %s906_s19 }
  0x2b   : > { %s912_s6 = sld [smem:[#allocation2 + %s200_s5]]  ;;  %vm235_vm0 = vcmp.eq.s32.totalorder %v910_v13, 127  ;;  %vm223_vm1 = vcmp.eq.s32.totalorder %v910_v13, 0  ;;  %v337_v22 = vcvt.s32.f32 %v286_v17  ;;  %v334_v25 = vcvt.s32.f32 %v910_v13  ;;  %s543_s28 = smul.u32 48, %s754_s12 }
  0x2c   : > { %v256_v6 = vrot.slane %v212_v5, 7  ;;  %s916_s8 = sld [smem:[#allocation2 + %s202_s7]]  ;;  %v279_v30 = vmul.f32 2.0, %v212_v5  ;;  %vm288_vm2 = vcmp.eq.s32.totalorder %v286_v17, 0  ;;  %vm292_vm3 = vcmp.lt.s32.totalorder %v286_v17, 1  ;;  %s195_s30 = scalar_lea.vmem [#allocation7], %s542_s29 }
  0x2d   : > { %s931_s23 = sld [smem:[#allocation2 + %s906_s19]]  ;;  %vm309_vm4 = vcmp.lt.s32.totalorder %v286_v17, 7  ;;  %v287_v35 = vadd.s32 8, %v286_v17  ;;  %s420_s12 = sshll.u32 %s195_s30, 4  ;;  %s421_s12 = int_to_ptr.vmem [resolvable:$true] %s420_s12 }
  0x2e   : > { %258 = vrot.lane.b32.xlu1 %v256_v6, %s767_s18  ;;  %s406_s26 = scalar_lea.sflag [#allocation4], %s885_s17 }
  0x2f   : > { %vm306_vm5 = vcmp.eq.s32.totalorder %v287_v35, 15 }
  0x30   : > { %217 = vrot.lane.b32.xlu0 %v895_v1, %s767_s18  ;;  %226 = vperm.xlu2 %624, %v893_v0   ;;  %s339_s15 = ssub.f32 0.0, %s205_s4 }
  0x31   : > { %s347_s22 = ssub.f32 0.0, %s912_s6 }
  0x32   : > { %v926_v24 = vstv %s339_s15  ;;  %v335_v36 = vstv %s916_s8  ;;  %s696_s8 = scalar_lea.hbm %s999_s2, 192 }
  0x33   : > { %v341_v33 = vadd.f32 %v926_v24, %v337_v22  ;;  %v937_v37 = vstv %s347_s22  ;;  %s343_s24 = ssub.f32 0.0, %s931_s23 }
  0x36   : > { %219 = vrot.lane.b32.xlu1 %v893_v0, %s768_s25 }
  0x38   : > { %230 = vperm.xlu0 %625, %v895_v1  }
  0x82   : > { %v222_v10 = vpop.permute.xlu2 %221 }
  0x8a   : > { %v227_v11 = vpop.permute.xlu2 %226 }
  0x9a   : > { %v216_v7 = vpop.permute.xlu0 %215 }
  0x9b   : > { %238 = vperm.xlu1 %626, %v216_v7   ;;  %v233_v21 = vsel %vm223_vm1, %v227_v11, %v216_v7 }
  0x9c   : > { %v251_v27 = vadd.f32 %v250_v19, %v233_v21 }
  0xa0   : > { %v259_v8 = vpop.permute.xlu1 %258 }
  0xa1   : > { %271 = vperm.xlu0 %625, %v259_v8   ;;  %v267_v28 = vrot.slane %v259_v8, 1 }
  0xa2   : > { %v218_v9 = vpop.permute.xlu0 %217 }
  0xa3   : > { %260 = vrot.lane.b32.xlu1 %v256_v6, %s768_s25  ;;  %243 = vperm.xlu2 %624, %v218_v9   ;;  %s419_s25 = scalar_lea.hbm %s999_s2, %s543_s28 }
  0xa4   : > { %s422_s19 = sshll.u32 %s419_s25, 4  ;;  %s423_s19 = int_to_ptr.hbm [resolvable:$true] %s422_s19 }
  0xa5   : > { %s690_s4 = sshra.s32 %s423_s19, 4  ;;  %s691_s4 = int_to_ptr.hbm [resolvable:$true] %s690_s4 }
  0xa6   : > { %s692_s5 = scalar_lea.hbm %s691_s4, 48  ;;  %p697_p10 = scmp.lt.s32.totalorder %s691_s4, %s999_s2 }
  0xa7   : > { %p693_p3 = scmp.ne.s32.totalorder %s691_s4, %s692_s5  ;;  %p698_p11 = scmp.lt.s32.totalorder %s696_s8, %s692_s5 }
  0xa8   : > { %v220_v15 = vpop.permute.xlu1 %219 }
  0xa9   : > { %p694_p5 = pnand %p693_p3, %p835_p8  ;;  %p699_p12 = por %p698_p11, %p697_p10 }
  0xaa   : > { %v231_v16 = vpop.permute.xlu0 %230 }
  0xab   : > { %263 = vperm.xlu2 %624, %v212_v5   ;;  %v234_v18 = vsel %vm223_vm1, %v231_v16, %v218_v9  ;;  %v336_v9 = vsub.f32 %v334_v25, %v335_v36  ;;  %p695_p7 = pneg %p694_p5 }
  0xac   : > { %v252_v23 = vadd.f32 %v234_v18, %v208_v2 }
  0xad   : > { %p700_p13 = pnand %p699_p12, %p695_p7 }
  0xfd   : > { %v244_v14 = vpop.permute.xlu2 %243 }
  0xfe   : > { %v247_v20 = vsel %vm235_vm0, %v244_v14, %v222_v10 }
  0xff   : > { %v249_v26 = vsub.f32 %v247_v20, %v234_v18  ;;  %v254_v29 = vadd.f32 %v252_v23, %v247_v20 }
 0x101   : > { %v291_v38 = vrot.slane %v249_v26, 7  ;;  %v299_v42 = vrot.slane %v254_v29, 7  ;;  %v308_v43 = vrot.slane %v249_v26, 1  ;;  %v316_v44 = vrot.slane %v254_v29, 1 }
 0x102   : > { %v323_v45 = vmul.f32 2.0, %v249_v26 }
 0x105   : > { %v264_v31 = vpop.permute.xlu2 %263 }
 0x106   : > { %v269_v39 = vsel %vm223_vm1, %v264_v31, %v267_v28 }
 0x107   : > { %v276_v50 = vrot.slane %v269_v39, 7  ;;  %v280_v6 = vadd.f32 %v279_v30, %v269_v39 }
 0x10d   : > { %v239_v32 = vpop.permute.xlu1 %238 }
 0x10e   : > { %v246_v34 = vsel %vm235_vm0, %v239_v32, %v220_v15  ;;  %v344_v15 = vstv %s343_s24 }
 0x10f   : > { %v248_v40 = vsub.f32 %v246_v34, %v233_v21  ;;  %v253_v41 = vadd.f32 %v251_v27, %v246_v34  ;;  %v338_v21 = vcvt.s32.f32 %v287_v35 }
 0x111   : > { %v290_v46 = vrot.slane %v248_v40, 7  ;;  %v295_v47 = vperm.slane %v248_v40, 0  ;;  %v298_v48 = vrot.slane %v253_v41, 7  ;;  %v302_v49 = vperm.slane %v253_v41, 0 }
 0x112   : > { %v307_v51 = vrot.slane %v248_v40, 1  ;;  %v315_v52 = vrot.slane %v253_v41, 1  ;;  %v322_v53 = vmul.f32 2.0, %v248_v40  ;;  %v342_v34 = vadd.f32 %v926_v24, %v338_v21 }
 0x113   : > { %v294_v54 = vsel %vm292_vm3, %v291_v38, %v290_v46  ;;  %v301_v55 = vsel %vm292_vm3, %v299_v42, %v298_v48  ;;  %v293_v56 = vsel %vm292_vm3, %v290_v46, %v291_v38  ;;  %v300_v57 = vsel %vm292_vm3, %v298_v48, %v299_v42  ;;  %v272_v3 = vpop.permute.xlu0 %271 }
 0x114   : > { %v296_v58 = vsel %vm288_vm2, %v295_v47, %v294_v54  ;;  %v303_v59 = vsel %vm288_vm2, %v302_v49, %v301_v55  ;;  %v310_v60 = vsel %vm309_vm4, %v307_v51, %v308_v43  ;;  %v317_v61 = vsel %vm309_vm4, %v315_v52, %v316_v44 }
 0x115   : > { %v318_v62 = vsel %vm309_vm4, %v316_v44, %v315_v52  ;;  %v324_v63 = vadd.f32 %v322_v53, %v296_v58  ;;  %v330_v2 = vsub.f32 %v317_v61, %v303_v59  ;;  %v261_v4 = vpop.permute.xlu1 %260  ;;  %v311_v5 = vsel %vm309_vm4, %v308_v43, %v307_v51 }
 0x116   : > { %v274_v7 = vsel %vm235_vm0, %v272_v3, %v261_v4  ;;  %v325_v8 = vadd.f32 %v323_v45, %v293_v56 }
 0x117   : > { %v326_v10 = vadd.f32 %v324_v63, %v310_v60  ;;  %v332_v11 = vmul.f32 0.125, %v330_v2  ;;  %v278_v12 = vsub.f32 %v274_v7, %v276_v50  ;;  %v282_v14 = vrot.slane %v274_v7, 1 }
 0x119   : > { %v284_v16 = vadd.f32 %v282_v14, %v280_v6  ;;  %v312_v18 = vperm.slane %v278_v12, 0  ;;  %v328_v19 = vmul.f32 0.125, %v326_v10  ;;  %v353_v20 = vmul.f32 %v341_v33, %v332_v11 }
 0x11a   : > { %v349_v17 = vmul.f32 %v937_v37, %v332_v11 }
 0x11b   : > { %v314_v22 = vsel %vm306_vm5, %v312_v18, %v311_v5  ;;  %v319_v23 = vperm.slane %v284_v16, 7  ;;  %v345_v26 = vmul.f32 %v344_v15, %v328_v19  ;;  %v351_v13 = vmul.f32 %v336_v9, %v328_v19 }
 0x11c   : > { %v327_v27 = vadd.f32 %v325_v8, %v314_v22  ;;  %v361_v30 = vmul.f32 %v349_v17, %v349_v17 }
 0x11d   : > { %v321_v28 = vsel %vm306_vm5, %v319_v23, %v318_v62  ;;  %v355_v25 = vadd.f32 %v353_v20, %v351_v13  ;;  %v359_v29 = vmul.f32 %v345_v26, %v345_v26 }
 0x11e   : > { %v329_v31 = vmul.f32 0.125, %v327_v27  ;;  %v331_v32 = vsub.f32 %v321_v28, %v300_v57 }
 0x11f   : > { %v357_v36 = vadd.f32 %v355_v25, %v893_v0  ;;  %v363_v38 = vadd.f32 %v361_v30, %v359_v29 }
 0x120   : > { %v333_v33 = vmul.f32 0.125, %v331_v32  ;;  %v346_v35 = vmul.f32 %v344_v15, %v329_v31  ;;  %v352_v41 = vmul.f32 %v336_v9, %v329_v31 }
 0x121   : > { %v365_v39 = vmul.f32 %v357_v36, %v357_v36 }
 0x122   : > { %v350_v40 = vmul.f32 %v937_v37, %v333_v33  ;;  %v354_v42 = vmul.f32 %v342_v34, %v333_v33  ;;  %v360_v45 = vmul.f32 %v346_v35, %v346_v35 }
 0x123   : > { %v367_v43 = vadd.f32 %v365_v39, %v363_v38 }
 0x124   : > { %v356_v44 = vadd.f32 %v354_v42, %v352_v41  ;;  %v362_v46 = vmul.f32 %v350_v40, %v350_v40 }
 0x125   : > { %v369_v47 = vmax.f32 %v367_v43, 1e-24 }
 0x126   : > { %v358_v48 = vadd.f32 %v356_v44, %v895_v1  ;;  %v364_v49 = vadd.f32 %v362_v46, %v360_v45 }
 0x127   : > { %627 = vrsqrt.f32 %v369_v47  ;;  %vm377_vm7 = vweird.f32 %v369_v47 }
 0x128   : > { %v366_v24 = vmul.f32 %v358_v48, %v358_v48 }
 0x12a   : > { %v368_v0 = vadd.f32 %v366_v24, %v364_v49 }
 0x12c   : > { %v370_v50 = vmax.f32 %v368_v0, 1e-24 }
 0x12d   : > { %v628_v51 = vpop.eup %627 }
 0x12e   : > { %v372_v52 = vmul.f32 %v628_v51, %v369_v47  ;;  %629 = vrsqrt.f32 %v370_v50  ;;  %vm378_vm6 = vweird.f32 %v628_v51  ;;  %vm387_vm10 = vweird.f32 %v370_v50 }
 0x12f   : > { %vm379_vm8 = vmor %vm377_vm7, %vm378_vm6 }
 0x130   : > { %v373_v37 = vmul.f32 %v628_v51, %v372_v52 }
 0x132   : > { %v374_v53 = vmul.f32 0.5, %v373_v37 }
 0x134   : > { %v630_v54 = vpop.eup %629  ;;  %v375_v55 = vsub.f32 1.5, %v374_v53 }
 0x135   : > { %v382_v56 = vmul.f32 %v630_v54, %v370_v50  ;;  %vm388_vm9 = vweird.f32 %v630_v54 }
 0x136   : > { %v376_v57 = vmul.f32 %v628_v51, %v375_v55  ;;  %vm389_vm11 = vmor %vm387_vm10, %vm388_vm9 }
 0x137   : > { %v383_v1 = vmul.f32 %v630_v54, %v382_v56 }
 0x138   : > { %v380_v58 = vsel %vm379_vm8, %v628_v51, %v376_v57 }
 0x139   : > { %v384_v59 = vmul.f32 0.5, %v383_v1  ;;  %v391_v60 = vmul.f32 %v380_v58, %v345_v26  ;;  %v393_v61 = vmul.f32 %v380_v58, %v349_v17  ;;  %v395_v62 = vmul.f32 %v380_v58, %v357_v36 }
 0x13b   : > { %v385_v63 = vsub.f32 1.5, %v384_v59  ;;  %397 = vst [vmem:[%s195_s30] sm:$0xff] %v391_v60 }
 0x13c   : > { %534 = vst [vmem:[%s195_s30 + $0x10] sm:$0xff] %v393_v61 }
 0x13d   : > { %v386_v2 = vmul.f32 %v630_v54, %v385_v63  ;;  %536 = vst [vmem:[%s195_s30 + $0x20] sm:$0xff] %v395_v62 }
 0x13f   : > { %v390_v3 = vsel %vm389_vm11, %v630_v54, %v386_v2 }
 0x140   : > { %v392_v4 = vmul.f32 %v390_v3, %v346_v35  ;;  %v394_v5 = vmul.f32 %v390_v3, %v350_v40  ;;  %v396_v6 = vmul.f32 %v390_v3, %v358_v48 }
 0x142   : > { %398 = vst [vmem:[%s195_s30 + $0x8] sm:$0xff] %v392_v4 }
 0x143   : > { %535 = vst [vmem:[%s195_s30 + $0x18] sm:$0xff] %v394_v5 }
 0x144   : > { %537 = vst [vmem:[%s195_s30 + $0x28] sm:$0xff] %v396_v6 }
 0x145   : > { %703 = shalt.err (!%p700_p13)
}
 0x146   : > { %s770_s17 = smov 128   ;;  %s771_s23 = smov 8  }
 0x147   : > { %550 = dma.vmem_to_hbm [thread:$0]  (%p835_p8), %s421_s12, 768, %s423_s19, %s406_s26, %s770_s17, %s770_s17, %s771_s23  }
 0x148 PF: > { %p567_p0 = scmp.ge.s32.totalorder %s762_s14, 2  ;;  %s437_s24 = sand.u32 1, %s742_s9  }
 0x149   : > { %s438_s29 = scalar_lea.sflag [#allocation4], %s437_s24 }
 0x14a   : > { %p561_p1 = pnand %p567_p0, %p839_p9 }
 0x14c   : > { %p562_p2 = pneg %p561_p1 }
 0x14e   : > { %737 = dma.done.wait (%p562_p2), %s438_s29, 768  }
 0x14f   : > { %739 = vsyncadd (%p562_p2), %s438_s29, 4294966528  ;;  %s19_s14 = sadd.s32 1, %s762_s14   ;;  %s1006_s9 = smov %s746_s10 }
 0x150   : > { %p16_p4 = scmp.ge.s32.totalorder %s19_s14, 6   ;;  %s1007_s10 = smov %s750_s11 }
 0x151   : > { %s1008_s11 = smov %s874_s16  ;;  %s1009_s12 = smov %s758_s13 }
 0x152   : > { %s1010_s13 = smov %s1012_s27  ;;  %18 = sbr.rel (!%p16_p4) target bundleno = 7 (0x7), region = 80 }
 0x157   :  { %444 = vsyncpa [#allocation3], 1 }
 0x158   :  { %446 = vsyncpa [#allocation3 + $0x1], 1 }
 0x159   :  { %447 = vsyncpa [#allocation4], 1 }
 0x15a   :  { %449 = vsyncpa [#allocation4 + $0x1], 1 }
 0x15b   :  { %450 = vsyncpa [#allocation5], 1 }
 0x15c   :  { %452 = vsyncpa [#allocation5 + $0x1], 1 }

</bundles_post_ra>
